<compile_context>
chip_gen: v5e
topology: v5e:2x2
jax: 0.10.0
libtpu: 0.0.40
codegen_flags: <defaults>
</compile_context>

<pallas_src>
import functools

import jax
import jax.numpy as jnp
from jax import lax
from jax.experimental import pallas as pl
from jax.experimental.pallas import tpu as pltpu


def _sigmoid(z):
    # sigmoid(z) = 0.5 * tanh(0.5 * z) + 0.5
    # Single EUP push per element (tanh); the extra mul/add go to the 4-wide,
    # underloaded VALU slots. Exact (no approx reciprocal).
    return 0.5 * jnp.tanh(0.5 * z) + 0.5


def _make_mlp_kernel(tile, chunk):
    """Build the kernel for a given (tile, chunk) lane decomposition."""
    assert tile % chunk == 0
    n_chunks = tile // chunk

    def kernel(x_ref, w1_ref, b1_ref, w2_ref, b2_ref, w3_ref, b3_ref, o_ref):
        # x_ref : (2, tile)   batch on lanes
        # w1_ref: (40, 2)     (out, in)
        # b1_ref: (40, 1)
        # w2_ref: (40, 40)    (out, in)
        # b2_ref: (40, 1)
        # w3_ref: (40, 1)     fc3 weight as a column (used via VPU mul + XLU reduce)
        # b3_ref: (1,)        SMEM scalar
        # o_ref : (1, tile)   lane-dense output

        w1 = w1_ref[...]                                     # (40, 2)
        w2 = w2_ref[...]                                     # (40, 40)
        b3 = b3_ref[0]                                       # scalar

        # Hoist the chunk-wide broadcasts out of the inner loop (JAX does not
        # CSE broadcast_in_dim, and the unrolled loop would re-emit them).
        w10 = jnp.broadcast_to(w1[:, 0:1], (40, chunk))      # (40, chunk)
        w11 = jnp.broadcast_to(w1[:, 1:2], (40, chunk))      # (40, chunk)
        b1 = jnp.broadcast_to(b1_ref[...], (40, chunk))      # (40, chunk)
        b2 = jnp.broadcast_to(b2_ref[...], (40, chunk))      # (40, chunk)
        w3c = jnp.broadcast_to(w3_ref[...], (40, chunk))     # (40, chunk)

        def body(c, carry):
            start = pl.multiple_of(c * chunk, 128)
            x0 = x_ref[0:1, pl.ds(start, chunk)]             # (1, chunk)
            x1 = x_ref[1:2, pl.ds(start, chunk)]             # (1, chunk)

            # fc1 on the VPU: K=2 contraction as two broadcast FMAs -> (40, chunk)
            h = _sigmoid(w10 * x0 + w11 * x1 + b1)

            # fc2 on the MXU: (40, 40) @ (40, chunk) -> (40, chunk)
            h = _sigmoid(
                jnp.dot(w2, h, preferred_element_type=jnp.float32) + b2
            )

            # fc3 as VPU multiply + sublane (XLU) reduce -> (1, chunk)
            y = jnp.sum(w3c * h, axis=0, keepdims=True) + b3
            o_ref[:, pl.ds(start, chunk)] = _sigmoid(y).astype(o_ref.dtype)
            return carry

        # Unrolled inner loop over lane sub-chunks: bounded vreg working set
        # per chunk while the grid-step overhead is amortised over the tile.
        lax.fori_loop(0, n_chunks, body, 0, unroll=True)

    return kernel


def feedforward_pallas(x, params, *, tile_n=2048, chunk_n=512):
    """x: [N, 2] float32. params: dict (weights [in,out], biases [1,out]).
    Returns [N, 1] float32."""
    n, in_dim = x.shape
    assert in_dim == 2
    assert tile_n % chunk_n == 0 and chunk_n % 128 == 0

    # Transpose the tiny parameters once into the layout the feature-major
    # kernel consumes.
    w1t = params["w1"].T.astype(jnp.float32)            # (40, 2)   (out, in)
    b1t = params["b1"].T.astype(jnp.float32)            # (40, 1)
    w2t = params["w2"].T.astype(jnp.float32)            # (40, 40)  (out, in)
    b2t = params["b2"].T.astype(jnp.float32)            # (40, 1)
    w3c = params["w3"].astype(jnp.float32)               # (40, 1)  column for XLU reduce
    b3s = params["b3"].reshape(1).astype(jnp.float32)    # (1,)     SMEM scalar

    # Tile selection:
    #  * tiny N        -> one lane-dense 128-wide (or 128-multiple) block
    #  * moderate N    -> single block rounded to 128 lanes (<= one chunk)
    #  * large N       -> big tiles (<= tile_n), but keep >= 2 grid steps so
    #                     v7x's two TensorCores can both be used.
    if n <= chunk_n:
        tile = max(128, pl.cdiv(n, 128) * 128)
        chunk = tile
    else:
        steps = max(2, pl.cdiv(n, tile_n))
        tile = min(tile_n, pl.cdiv(pl.cdiv(n, steps), chunk_n) * chunk_n)
        chunk = chunk_n
    n_pad = pl.cdiv(n, tile) * tile

    x_t = x.T.astype(jnp.float32)                         # (2, N) feature-major
    if n_pad != n:
        x_t = jnp.pad(x_t, ((0, 0), (0, n_pad - n)))

    grid = (n_pad // tile,)

    def bcast(shape):
        # Whole-array weight blocks, same block for every grid step.
        return pl.BlockSpec(shape, lambda i: tuple(0 for _ in shape))

    kernel = _make_mlp_kernel(tile, chunk)

    out_t = pl.pallas_call(
        kernel,
        out_shape=jax.ShapeDtypeStruct((1, n_pad), jnp.float32),
        grid_spec=pltpu.PrefetchScalarGridSpec(
            num_scalar_prefetch=0,
            grid=grid,
            in_specs=[
                pl.BlockSpec((2, tile), lambda i: (0, i)),          # x tile
                bcast((40, 2)),                                     # w1
                bcast((40, 1)),                                     # b1
                bcast((40, 40)),                                    # w2
                bcast((40, 1)),                                     # b2
                bcast((40, 1)),                                     # w3 column
                pl.BlockSpec(memory_space=pltpu.MemorySpace.SMEM),  # b3 scalar
            ],
            out_specs=pl.BlockSpec((1, tile), lambda i: (0, i)),
        ),
        compiler_params=pltpu.CompilerParams(
            dimension_semantics=("parallel",),
        ),
        cost_estimate=pl.CostEstimate(
            flops=3440 * n_pad,           # 2*(2*40 + 40*40 + 40*1) per row
            transcendentals=81 * n_pad,   # 81 tanh per row
            bytes_accessed=12 * n_pad + 7204,  # x + out + 1801 f32 params
        ),
    )(x_t, w1t, b1t, w2t, b2t, w3c, b3s)

    # (1, n_pad) -> (n_pad, 1) is a pure row-major reshape, then drop padding.
    return out_t.reshape(n_pad, 1)[:n]


def init_params(key):
    """Deterministic init matching the PyTorch layer shapes (stored [in, out])."""
    k1, k2, k3, k4, k5, k6 = jax.random.split(key, 6)

    def uniform(k, shape, fan_in):
        bound = 1.0 / jnp.sqrt(fan_in)
        return jax.random.uniform(k, shape, jnp.float32, -bound, bound)

    return {
        "w1": uniform(k1, (2, 40), 2),
        "b1": uniform(k2, (1, 40), 2),
        "w2": uniform(k3, (40, 40), 40),
        "b2": uniform(k4, (1, 40), 40),
        "w3": uniform(k5, (40, 1), 40),
        "b3": uniform(k6, (1, 1), 40),
    }


def feedforward_ref(x, p):
    """Pure-JAX reference of the PyTorch forward pass."""
    h = jax.nn.sigmoid(x @ p["w1"] + p["b1"])
    h = jax.nn.sigmoid(h @ p["w2"] + p["b2"])
    h = jax.nn.sigmoid(h @ p["w3"] + p["b3"])
    return h


if __name__ == "__main__":
    key = jax.random.PRNGKey(0)
    pkey, xkey = jax.random.split(key)
    params = init_params(pkey)

    # Small-shape check (single 128-lane padded block).
    x_small = jax.random.normal(xkey, (8, 2), dtype=jnp.float32)
    out_small = jax.block_until_ready(feedforward_pallas(x_small, params))
    ref_small = feedforward_ref(x_small, params)
    assert out_small.shape == (8, 1)
    assert jnp.max(jnp.abs(out_small - ref_small)) < 1e-2, "mismatch (small N)"

    # Check exercising the multi-step, sub-chunked, padded pipeline path.
    x_big = jax.random.normal(jax.random.PRNGKey(1), (2112, 2), dtype=jnp.float32)
    out_big = jax.block_until_ready(feedforward_pallas(x_big, params))
    ref_big = feedforward_ref(x_big, params)
    assert out_big.shape == (2112, 1)
    assert jnp.max(jnp.abs(out_big - ref_big)) < 1e-2, "mismatch (tiled N)"

    print("KERNEL_OK")
</pallas_src>

<mosaic_0001>
module attributes {stable_mosaic.version = 11 : i64} {
  func.func @kernel(%arg0: i32, %arg1: memref<2x128xf32, #tpu.memory_space<vmem>>, %arg2: memref<40x2xf32, #tpu.memory_space<vmem>>, %arg3: memref<40x1xf32, #tpu.memory_space<vmem>>, %arg4: memref<40x40xf32, #tpu.memory_space<vmem>>, %arg5: memref<40x1xf32, #tpu.memory_space<vmem>>, %arg6: memref<40x1xf32, #tpu.memory_space<vmem>>, %arg7: memref<1xf32, #tpu.memory_space<smem>>, %arg8: memref<1x128xf32, #tpu.memory_space<vmem>>) attributes {dimension_semantics = [#tpu.dimension_semantics<parallel>], iteration_bounds = array<i64: 1>, scalar_prefetch = 0 : i64, scratch_operands = 0 : i64, tpu.core_type = #tpu.core_type<tc>, window_params = [{transform_indices = @transform_0, window_bounds = array<i64: 2, 128>}, {pipeline_mode = #tpu.pipeline_mode<synchronous>, transform_indices = @transform_1, window_bounds = array<i64: 40, 2>}, {pipeline_mode = #tpu.pipeline_mode<synchronous>, transform_indices = @transform_2, window_bounds = array<i64: 40, 1>}, {pipeline_mode = #tpu.pipeline_mode<synchronous>, transform_indices = @transform_3, window_bounds = array<i64: 40, 40>}, {pipeline_mode = #tpu.pipeline_mode<synchronous>, transform_indices = @transform_4, window_bounds = array<i64: 40, 1>}, {pipeline_mode = #tpu.pipeline_mode<synchronous>, transform_indices = @transform_5, window_bounds = array<i64: 40, 1>}, {transform_indices = @transform_6, window_bounds = array<i64: 1>}, {transform_indices = @transform_7, window_bounds = array<i64: 1, 128>}]} {
    %c0 = arith.constant 0 : index
    %c0_0 = arith.constant 0 : index
    %0 = vector.load %arg2[%c0, %c0_0] : memref<40x2xf32, #tpu.memory_space<vmem>>, vector<40x2xf32>
    %c0_1 = arith.constant 0 : index
    %c0_2 = arith.constant 0 : index
    %1 = vector.load %arg4[%c0_1, %c0_2] : memref<40x40xf32, #tpu.memory_space<vmem>>, vector<40x40xf32>
    %c0_3 = arith.constant 0 : index
    %2 = memref.load %arg7[%c0_3] : memref<1xf32, #tpu.memory_space<smem>>
    %3 = vector.extract_strided_slice %0 {offsets = [0, 0], sizes = [40, 1], strides = [1, 1]} : vector<40x2xf32> to vector<40x1xf32>
    %4 = vector.shape_cast %3 : vector<40x1xf32> to vector<40x1xf32>
    %5 = vector.broadcast %4 : vector<40x1xf32> to vector<40x128xf32>
    %6 = vector.extract_strided_slice %0 {offsets = [0, 1], sizes = [40, 1], strides = [1, 1]} : vector<40x2xf32> to vector<40x1xf32>
    %7 = vector.shape_cast %6 : vector<40x1xf32> to vector<40x1xf32>
    %8 = vector.broadcast %7 : vector<40x1xf32> to vector<40x128xf32>
    %c0_4 = arith.constant 0 : index
    %c0_5 = arith.constant 0 : index
    %9 = vector.load %arg3[%c0_4, %c0_5] : memref<40x1xf32, #tpu.memory_space<vmem>>, vector<40x1xf32>
    %10 = vector.shape_cast %9 : vector<40x1xf32> to vector<40x1xf32>
    %11 = vector.broadcast %10 : vector<40x1xf32> to vector<40x128xf32>
    %c0_6 = arith.constant 0 : index
    %c0_7 = arith.constant 0 : index
    %12 = vector.load %arg5[%c0_6, %c0_7] : memref<40x1xf32, #tpu.memory_space<vmem>>, vector<40x1xf32>
    %13 = vector.shape_cast %12 : vector<40x1xf32> to vector<40x1xf32>
    %14 = vector.broadcast %13 : vector<40x1xf32> to vector<40x128xf32>
    %c0_8 = arith.constant 0 : index
    %c0_9 = arith.constant 0 : index
    %15 = vector.load %arg6[%c0_8, %c0_9] : memref<40x1xf32, #tpu.memory_space<vmem>>, vector<40x1xf32>
    %16 = vector.shape_cast %15 : vector<40x1xf32> to vector<40x1xf32>
    %17 = vector.broadcast %16 : vector<40x1xf32> to vector<40x128xf32>
    %c0_i32 = arith.constant 0 : i32
    %c128_i32 = arith.constant 128 : i32
    %18 = arith.muli %c0_i32, %c128_i32 : i32
    %19 = tpu.assume_multiple %18, 128 : i32
    %c0_10 = arith.constant 0 : index
    %20 = arith.index_cast %19 : i32 to index
    %21 = vector.load %arg1[%c0_10, %20] : memref<2x128xf32, #tpu.memory_space<vmem>>, vector<1x128xf32>
    %c1 = arith.constant 1 : index
    %22 = arith.index_cast %19 : i32 to index
    %23 = vector.load %arg1[%c1, %22] : memref<2x128xf32, #tpu.memory_space<vmem>>, vector<1x128xf32>
    %24 = vector.broadcast %21 : vector<1x128xf32> to vector<40x128xf32>
    %25 = arith.mulf %5, %24 : vector<40x128xf32>
    %26 = vector.broadcast %23 : vector<1x128xf32> to vector<40x128xf32>
    %27 = arith.mulf %8, %26 : vector<40x128xf32>
    %28 = arith.addf %25, %27 : vector<40x128xf32>
    %29 = arith.addf %28, %11 : vector<40x128xf32>
    %cst = arith.constant 5.000000e-01 : f32
    %30 = vector.broadcast %cst : f32 to vector<40x128xf32>
    %31 = arith.mulf %30, %29 : vector<40x128xf32>
    %32 = math.tanh %31 : vector<40x128xf32>
    %cst_11 = arith.constant 5.000000e-01 : f32
    %33 = vector.broadcast %cst_11 : f32 to vector<40x128xf32>
    %34 = arith.mulf %33, %32 : vector<40x128xf32>
    %cst_12 = arith.constant 5.000000e-01 : f32
    %35 = vector.broadcast %cst_12 : f32 to vector<40x128xf32>
    %36 = arith.addf %34, %35 : vector<40x128xf32>
    %cst_13 = arith.constant dense<0.000000e+00> : vector<40x128xf32>
    %37 = tpu.matmul %1, %36, %cst_13 {dimension_numbers = #tpu.dot_dimension_numbers<[1], [0], [0], [1], [0, 0, 1, 1], [], []>} : vector<40x40xf32>, vector<40x128xf32>, vector<40x128xf32> -> vector<40x128xf32>
    %38 = arith.addf %37, %14 : vector<40x128xf32>
    %cst_14 = arith.constant 5.000000e-01 : f32
    %39 = vector.broadcast %cst_14 : f32 to vector<40x128xf32>
    %40 = arith.mulf %39, %38 : vector<40x128xf32>
    %41 = math.tanh %40 : vector<40x128xf32>
    %cst_15 = arith.constant 5.000000e-01 : f32
    %42 = vector.broadcast %cst_15 : f32 to vector<40x128xf32>
    %43 = arith.mulf %42, %41 : vector<40x128xf32>
    %cst_16 = arith.constant 5.000000e-01 : f32
    %44 = vector.broadcast %cst_16 : f32 to vector<40x128xf32>
    %45 = arith.addf %43, %44 : vector<40x128xf32>
    %46 = arith.mulf %17, %45 : vector<40x128xf32>
    %cst_17 = arith.constant dense<0.000000e+00> : vector<128xf32>
    %47 = vector.multi_reduction <add>, %46, %cst_17 [0] : vector<40x128xf32> to vector<128xf32>
    %48 = vector.shape_cast %47 : vector<128xf32> to vector<1x128xf32>
    %49 = vector.broadcast %2 : f32 to vector<1x128xf32>
    %50 = arith.addf %48, %49 : vector<1x128xf32>
    %cst_18 = arith.constant 5.000000e-01 : f32
    %51 = vector.broadcast %cst_18 : f32 to vector<1x128xf32>
    %52 = arith.mulf %51, %50 : vector<1x128xf32>
    %53 = math.tanh %52 : vector<1x128xf32>
    %cst_19 = arith.constant 5.000000e-01 : f32
    %54 = vector.broadcast %cst_19 : f32 to vector<1x128xf32>
    %55 = arith.mulf %54, %53 : vector<1x128xf32>
    %cst_20 = arith.constant 5.000000e-01 : f32
    %56 = vector.broadcast %cst_20 : f32 to vector<1x128xf32>
    %57 = arith.addf %55, %56 : vector<1x128xf32>
    %c0_21 = arith.constant 0 : index
    %58 = arith.index_cast %19 : i32 to index
    %59 = vector.load %arg8[%c0_21, %58] : memref<1x128xf32, #tpu.memory_space<vmem>>, vector<1x128xf32>
    tpu.vector_store %arg8[%c0_21, %58], %57 {strides = array<i32>} : memref<1x128xf32, #tpu.memory_space<vmem>>, vector<1x128xf32>,
    %c1_i32 = arith.constant 1 : i32
    return
  }
  func.func @transform_0(%arg0: i32) -> (i32, i32) {
    %c0_i32 = arith.constant 0 : i32
    %c0_i32_0 = arith.constant 0 : i32
    return %c0_i32, %arg0 : i32, i32
  }
  func.func @transform_1(%arg0: i32) -> (i32, i32) {
    %c0_i32 = arith.constant 0 : i32
    %c0_i32_0 = arith.constant 0 : i32
    %c0_i32_1 = arith.constant 0 : i32
    return %c0_i32, %c0_i32_0 : i32, i32
  }
  func.func @transform_2(%arg0: i32) -> (i32, i32) {
    %c0_i32 = arith.constant 0 : i32
    %c0_i32_0 = arith.constant 0 : i32
    %c0_i32_1 = arith.constant 0 : i32
    return %c0_i32, %c0_i32_0 : i32, i32
  }
  func.func @transform_3(%arg0: i32) -> (i32, i32) {
    %c0_i32 = arith.constant 0 : i32
    %c0_i32_0 = arith.constant 0 : i32
    %c0_i32_1 = arith.constant 0 : i32
    return %c0_i32, %c0_i32_0 : i32, i32
  }
  func.func @transform_4(%arg0: i32) -> (i32, i32) {
    %c0_i32 = arith.constant 0 : i32
    %c0_i32_0 = arith.constant 0 : i32
    %c0_i32_1 = arith.constant 0 : i32
    return %c0_i32, %c0_i32_0 : i32, i32
  }
  func.func @transform_5(%arg0: i32) -> (i32, i32) {
    %c0_i32 = arith.constant 0 : i32
    %c0_i32_0 = arith.constant 0 : i32
    %c0_i32_1 = arith.constant 0 : i32
    return %c0_i32, %c0_i32_0 : i32, i32
  }
  func.func @transform_6(%arg0: i32) -> i32 {
    %c0_i32 = arith.constant 0 : i32
    %c0_i32_0 = arith.constant 0 : i32
    return %c0_i32 : i32
  }
  func.func @transform_7(%arg0: i32) -> (i32, i32) {
    %c0_i32 = arith.constant 0 : i32
    %c0_i32_0 = arith.constant 0 : i32
    return %c0_i32, %arg0 : i32, i32
  }
}

</mosaic_0001>

<bundles_post_ra>
// kernel: tpu_custom_call.1
= control target key start
LH: loop header
LB: loop body
LE: loop exit
PB: predicated region body
PF: predicated region fallthrough
CT: control target
= control target key end

     0   :  { %v406_v3 = vmov 0   ;;  %s536_s0 = inlined_call_operand.vmem [shape: f32[2,128], index: 0, kind: input, shape index: {}]   ;;  %s537_s1 = inlined_call_operand.vmem [shape: f32[40,2], index: 1, kind: input, shape index: {}]   ;;  %s538_s2 = inlined_call_operand.vmem [shape: f32[40,1], index: 2, kind: input, shape index: {}]   ;;  %s539_s3 = inlined_call_operand.vmem [shape: f32[40,40], index: 3, kind: input, shape index: {}]   ;;  %s540_s4 = inlined_call_operand.vmem [shape: f32[40,1], index: 4, kind: input, shape index: {}]   ;;  %s541_s5 = inlined_call_operand.vmem [shape: f32[40,1], index: 5, kind: input, shape index: {}]   ;;  %s542_s6 = inlined_call_operand.<no memory space> [shape: f32[1], index: 6, kind: input, shape index: {}]   ;;  %s543_s7 = inlined_call_operand.hbm [shape: f32[1,128], index: 7, kind: output, shape index: {}]  }
   0x1   :  { %v32_v0 = vld [vmem:[%s537_s1 + $0x20] sm:$0xff]  ;;  %v31_v1 = vld [vmem:[%s537_s1 + $0x18] sm:$0xff]  ;;  %v30_v2 = vld [vmem:[%s537_s1 + $0x10] sm:$0xff]  ;;  %351 = vset.pattern.permute.xlu2 %v406_v3  ;;  %349 = vset.pattern.permute.xlu1 %v406_v3 }
   0x2   :  { %347 = vset.pattern.permute.xlu0 %v406_v3  ;;  %56 = vperm.xlu1 %349, %v31_v1  }
   0x3   :  { %61 = vperm.xlu0 %347, %v32_v0   ;;  %51 = vperm.xlu2 %351, %v30_v2  }
   0x4   :  { %13 = vsyncpa [#allocation4], 0  ;;  %v407_v4 = vmov 1   ;;  %v29_v5 = vld [vmem:[%s537_s1 + $0x8] sm:$0xff]  ;;  %v88_v6 = vld [vmem:[%s538_s2 + $0x20] sm:$0xff]  ;;  %vm218_vm0 = vcmask 326656  }
   0x5   :  { %v28_v7 = vld [vmem:[%s537_s1] sm:$0xff]  ;;  %v87_v8 = vld [vmem:[%s538_s2 + $0x18] sm:$0xff]  ;;  %v86_v9 = vld [vmem:[%s538_s2 + $0x10] sm:$0xff]  ;;  %s408_s26 = smov [#allocation3]   ;;  %s315_s30 = sshll.u32 %s543_s7, 4  ;;  %s316_s30 = int_to_ptr.hbm [resolvable:$true] %s315_s30 }
   0x6   :  { %v84_v10 = vld [vmem:[%s538_s2] sm:$0xff]  ;;  %v85_v11 = vld [vmem:[%s538_s2 + $0x8] sm:$0xff]  ;;  %v116_v15 = vld [vmem:[%s540_s4 + $0x10] sm:$0xff]  ;;  %s313_s27 = sshll.u32 %s408_s26, 4  ;;  %s314_s27 = int_to_ptr.vmem [resolvable:$true] %s313_s27 }
   0x7   :  { %v114_v12 = vld [vmem:[%s540_s4] sm:$0xff]  ;;  %v115_v14 = vld [vmem:[%s540_s4 + $0x8] sm:$0xff]  ;;  %v146_v16 = vld [vmem:[%s541_s5 + $0x10] sm:$0xff] }
   0x8   :  { %v118_v13 = vld [vmem:[%s540_s4 + $0x20] sm:$0xff]  ;;  %v117_v17 = vld [vmem:[%s540_s4 + $0x18] sm:$0xff]  ;;  %v145_v19 = vld [vmem:[%s541_s5 + $0x8] sm:$0xff] }
   0x9   :  { %v144_v18 = vld [vmem:[%s541_s5] sm:$0xff]  ;;  %v147_v20 = vld [vmem:[%s541_s5 + $0x18] sm:$0xff] }
   0xa   :  { %350 = vset.pattern.permute.xlu1 %v407_v4  ;;  %v148_v21 = vld [vmem:[%s541_s5 + $0x20] sm:$0xff] }
   0xb   :  { %348 = vset.pattern.permute.xlu0 %v407_v4  ;;  %352 = vset.pattern.permute.xlu2 %v407_v4  ;;  %v357_v29 = vld [vmem:[%s536_s0 + $0x1] ss:$0 sm:$0xff]  ;;  %v356_v30 = vld [vmem:[%s536_s0] ss:$0 sm:$0xff] }
   0xc   :  { %81 = vperm.xlu0 %348, %v32_v0   ;;  %77 = vperm.xlu1 %350, %v31_v1  }
   0xd   :  { %73 = vperm.xlu2 %352, %v30_v2  }
  0x14   :  { %353 = vset.pattern.permute.xlu1 %v406_v3  ;;  %69 = vperm.xlu0 %348, %v29_v5  }
  0x15   :  { %354 = vset.pattern.permute.xlu2 %v406_v3  ;;  %111 = vperm.xlu1 %353, %v88_v6  }
  0x16   :  { %46 = vperm.xlu2 %354, %v29_v5  }
  0x1c   :  { %65 = vperm.xlu0 %348, %v28_v7  }
  0x1d   :  { %106 = vperm.xlu1 %353, %v87_v8  }
  0x1e   :  { %41 = vperm.xlu2 %354, %v28_v7  }
  0x24   :  { %355 = vset.pattern.permute.xlu0 %v406_v3 }
  0x25   :  { %101 = vperm.xlu1 %353, %v86_v9   ;;  %91 = vperm.xlu0 %355, %v84_v10  }
  0x26   :  { %96 = vperm.xlu2 %354, %v85_v11  }
  0x2d   :  { %121 = vperm.xlu1 %353, %v114_v12   ;;  %141 = vperm.xlu0 %355, %v118_v13  }
  0x2e   :  { %126 = vperm.xlu2 %354, %v115_v14  }
  0x35   :  { %131 = vperm.xlu1 %353, %v116_v15   ;;  %161 = vperm.xlu0 %355, %v146_v16   ;;  %v33_v15 = vld [vmem:[%s539_s3] sm:$0xff]  ;;  %v34_v16 = vld [vmem:[%s539_s3 + $0x8] sm:$0xff] }
  0x36   :  { %136 = vperm.xlu2 %354, %v117_v17   ;;  %v35_v17 = vld [vmem:[%s539_s3 + $0x10] sm:$0xff] }
  0x3d   :  { %151 = vperm.xlu1 %353, %v144_v18   ;;  %v36_v18 = vld [vmem:[%s539_s3 + $0x18] sm:$0xff] }
  0x3e   :  { %156 = vperm.xlu2 %354, %v145_v19   ;;  %v37_v19 = vld [vmem:[%s539_s3 + $0x20] sm:$0xff] }
  0x45   :  { %166 = vperm.xlu1 %353, %v147_v20  }
  0x46   :  { %171 = vperm.xlu2 %354, %v148_v21  }
  0x5d   :  { %v52_v22 = vpop.permute.xlu2 %51 }
  0x5e   :  { %v179_v48 = vmul.f32 %v356_v30, %v52_v22 }
  0x67   :  { %v74_v23 = vpop.permute.xlu2 %73 }
  0x68   :  { %v185_v51 = vmul.f32 %v357_v29, %v74_v23 }
  0x6a   :  { %v190_v59 = vadd.f32 %v185_v51, %v179_v48 }
  0x70   :  { %v47_v26 = vpop.permute.xlu2 %46 }
  0x71   :  { %v178_v38 = vmul.f32 %v356_v30, %v47_v26 }
  0x74   :  { %v57_v24 = vpop.permute.xlu1 %56 }
  0x75   :  { %v62_v25 = vpop.permute.xlu0 %61  ;;  %v180_v42 = vmul.f32 %v356_v30, %v57_v24 }
  0x76   :  { %v181_v32 = vmul.f32 %v356_v30, %v62_v25 }
  0x78   :  { %v42_v35 = vpop.permute.xlu2 %41 }
  0x79   :  { %v177_v56 = vmul.f32 %v356_v30, %v42_v35 }
  0x7e   :  { %v82_v27 = vpop.permute.xlu0 %81  ;;  %v78_v28 = vpop.permute.xlu1 %77 }
  0x7f   :  { %v187_v31 = vmul.f32 %v357_v29, %v82_v27  ;;  %v186_v39 = vmul.f32 %v357_v29, %v78_v28 }
  0x80   :  { %v97_v49 = vpop.permute.xlu2 %96 }
  0x81   :  { %v192_v34 = vadd.f32 %v187_v31, %v181_v32  ;;  %v191_v45 = vadd.f32 %v186_v39, %v180_v42 }
  0x86   :  { %v70_v33 = vpop.permute.xlu0 %69 }
  0x87   :  { %v112_v36 = vpop.permute.xlu1 %111  ;;  %v184_v40 = vmul.f32 %v357_v29, %v70_v33 }
  0x88   :  { %v197_v37 = vadd.f32 %v192_v34, %v112_v36  ;;  %v127_v20 = vpop.permute.xlu2 %126 }
  0x89   :  { %v189_v43 = vadd.f32 %v184_v40, %v178_v38 }
  0x8a   :  { %v202_v41 = vmul.f32 0.5, %v197_v37 }
  0x8b   :  { %v194_v52 = vadd.f32 %v189_v43, %v97_v49 }
  0x8c   :  { %358 = vtanh.f32 %v202_v41 }
  0x8d   :  { %v199_v58 = vmul.f32 0.5, %v194_v52 }
  0x8e   :  { %v66_v44 = vpop.permute.xlu0 %65 }
  0x8f   :  { %v107_v46 = vpop.permute.xlu1 %106  ;;  %v183_v53 = vmul.f32 %v357_v29, %v66_v44 }
  0x90   :  { %v196_v47 = vadd.f32 %v191_v45, %v107_v46  ;;  %v137_v28 = vpop.permute.xlu2 %136 }
  0x91   :  { %v188_v60 = vadd.f32 %v183_v53, %v177_v56 }
  0x92   :  { %v359_v50 = vpop.eup %358  ;;  %v201_v54 = vmul.f32 0.5, %v196_v47 }
  0x93   :  { %v212_v55 = vmul.f32 0.5, %v359_v50 }
  0x94   :  { %360 = vtanh.f32 %v201_v54 }
  0x95   :  { %v217_v57 = vadd.f32 0.5, %v212_v55  ;;  %362 = vtanh.f32 %v199_v58 }
  0x97   :  { %245 = vmatpush.msra.mxu0 %v217_v57  ;;  %329 = vmatpush.msra.mxu1 %v217_v57  ;;  %v102_v61 = vpop.permute.xlu1 %101  ;;  %v92_v62 = vpop.permute.xlu0 %91 }
  0x98   :  { %330 = vmatpush.msra.mxu2 %v217_v57  ;;  %331 = vmatpush.msra.mxu3 %v217_v57  ;;  %v195_v63 = vadd.f32 %v190_v59, %v102_v61  ;;  %v193_v0 = vadd.f32 %v188_v60, %v92_v62  ;;  %v157_v50 = vpop.permute.xlu2 %156 }
  0x9a   :  { %v361_v1 = vpop.eup %360  ;;  %v200_v2 = vmul.f32 0.5, %v195_v63  ;;  %v198_v3 = vmul.f32 0.5, %v193_v0 }
  0x9b   :  { %v211_v4 = vmul.f32 0.5, %v361_v1  ;;  %v363_v6 = vpop.eup %362 }
  0x9c   :  { %364 = vtanh.f32 %v200_v2  ;;  %v209_v9 = vmul.f32 0.5, %v363_v6 }
  0x9d   :  { %v216_v5 = vadd.f32 0.5, %v211_v4  ;;  %366 = vtanh.f32 %v198_v3 }
  0x9e   :  { %v214_v13 = vadd.f32 0.5, %v209_v9 }
  0x9f   :  { %246 = vmatpush.msra.mxu0 %v216_v5  ;;  %332 = vmatpush.msra.mxu1 %v216_v5  ;;  %v122_v21 = vpop.permute.xlu1 %121  ;;  %v142_v38 = vpop.permute.xlu0 %141 }
  0xa0   :  { %333 = vmatpush.msra.mxu2 %v216_v5  ;;  %334 = vmatpush.msra.mxu3 %v216_v5  ;;  %v172_v1 = vpop.permute.xlu2 %171 }
  0xa2   :  { %v365_v7 = vpop.eup %364 }
  0xa3   :  { %v367_v8 = vpop.eup %366  ;;  %v210_v10 = vmul.f32 0.5, %v365_v7 }
  0xa4   :  { %v208_v12 = vmul.f32 0.5, %v367_v8 }
  0xa5   :  { %v215_v11 = vadd.f32 0.5, %v210_v10  ;;  %v301_v10 = vstv %s542_s6 }
  0xa6   :  { %v213_v14 = vadd.f32 0.5, %v208_v12 }
  0xa7   :  { %247 = vmatpush.msra.mxu0 %v215_v11  ;;  %335 = vmatpush.msra.mxu1 %v215_v11  ;;  %v132_v29 = vpop.permute.xlu1 %131  ;;  %v162_v55 = vpop.permute.xlu0 %161 }
  0xa8   :  { %336 = vmatpush.msra.mxu2 %v215_v11  ;;  %337 = vmatpush.msra.mxu3 %v215_v11 }
  0xa9   :  { %248 = vmatpush.msra.mxu0 %v214_v13  ;;  %338 = vmatpush.msra.mxu1 %v214_v13 }
  0xaa   :  { %339 = vmatpush.msra.mxu2 %v214_v13  ;;  %340 = vmatpush.msra.mxu3 %v214_v13 }
  0xab   :  { %249 = vmatpush.msra.mxu0 %v213_v14  ;;  %341 = vmatpush.msra.mxu1 %v213_v14 }
  0xac   :  { %342 = vmatpush.msra.mxu2 %v213_v14  ;;  %343 = vmatpush.msra.mxu3 %v213_v14 }
  0xad   :  { %324 = vmatmul.msk.f32.vlgmr.msra.gmra.mxu0 %vm218_vm0, %v33_v15  ;;  %325 = vmatmul.msk.f32.vlgmr.msra.gmra.mxu1 %vm218_vm0, %v34_v16 }
  0xae   :  { %326 = vmatmul.msk.f32.vlgmr.msra.gmra.mxu2 %vm218_vm0, %v35_v17  ;;  %327 = vmatmul.msk.f32.vlgmr.msra.gmra.mxu3 %vm218_vm0, %v36_v18 }
  0xaf   :  { %v152_v46 = vpop.permute.xlu1 %151 }
  0xb6   :  { %328 = vmatmul.msk.f32.gmra.mxu3 %vm218_vm0, %v37_v19 }
  0xb7   :  { %v167_v62 = vpop.permute.xlu1 %166 }
 0x12a   :  { %v251_v22 = vpop.f32.mrf.mxu0  ;;  %v254_v23 = vpop.f32.mrf.mxu1 }
 0x12b   :  { %v252_v24 = vadd.f32 %v251_v22, %v122_v21  ;;  %v255_v25 = vadd.f32 %v254_v23, %v127_v20 }
 0x12d   :  { %v266_v26 = vmul.f32 0.5, %v252_v24  ;;  %v267_v27 = vmul.f32 0.5, %v255_v25 }
 0x12f   :  { %368 = vtanh.f32 %v266_v26 }
 0x130   :  { %370 = vtanh.f32 %v267_v27 }
 0x131   :  { %v257_v30 = vpop.f32.mrf.mxu2  ;;  %v260_v31 = vpop.f32.mrf.mxu3 }
 0x132   :  { %v258_v32 = vadd.f32 %v257_v30, %v132_v29  ;;  %v261_v33 = vadd.f32 %v260_v31, %v137_v28 }
 0x134   :  { %v268_v34 = vmul.f32 0.5, %v258_v32  ;;  %v269_v35 = vmul.f32 0.5, %v261_v33 }
 0x135   :  { %v369_v36 = vpop.eup %368 }
 0x136   :  { %v371_v37 = vpop.eup %370  ;;  %372 = vtanh.f32 %v268_v34  ;;  %v276_v39 = vmul.f32 0.5, %v369_v36 }
 0x137   :  { %v277_v40 = vmul.f32 0.5, %v371_v37  ;;  %374 = vtanh.f32 %v269_v35 }
 0x138   :  { %v281_v43 = vadd.f32 0.5, %v276_v39 }
 0x139   :  { %v263_v41 = vpop.f32.mrf.mxu3  ;;  %v282_v44 = vadd.f32 0.5, %v277_v40 }
 0x13a   :  { %v264_v42 = vadd.f32 %v263_v41, %v142_v38  ;;  %v286_v51 = vmul.f32 %v281_v43, %v152_v46 }
 0x13b   :  { %v287_v52 = vmul.f32 %v282_v44, %v157_v50 }
 0x13c   :  { %v373_v45 = vpop.eup %372  ;;  %v270_v47 = vmul.f32 0.5, %v264_v42 }
 0x13d   :  { %v375_v48 = vpop.eup %374  ;;  %v278_v49 = vmul.f32 0.5, %v373_v45  ;;  %v291_v57 = vadd.f32 %v287_v52, %v286_v51 }
 0x13e   :  { %376 = vtanh.f32 %v270_v47  ;;  %v279_v54 = vmul.f32 0.5, %v375_v48 }
 0x13f   :  { %v283_v53 = vadd.f32 0.5, %v278_v49 }
 0x140   :  { %v284_v58 = vadd.f32 0.5, %v279_v54 }
 0x141   :  { %v288_v56 = vmul.f32 %v283_v53, %v162_v55 }
 0x142   :  { %v289_v63 = vmul.f32 %v284_v58, %v167_v62 }
 0x143   :  { %v292_v60 = vadd.f32 %v291_v57, %v288_v56 }
 0x144   :  { %v377_v59 = vpop.eup %376 }
 0x145   :  { %v280_v61 = vmul.f32 0.5, %v377_v59  ;;  %v293_v2 = vadd.f32 %v292_v60, %v289_v63 }
 0x147   :  { %v285_v0 = vadd.f32 0.5, %v280_v61 }
 0x149   :  { %v290_v3 = vmul.f32 %v285_v0, %v172_v1 }
 0x14b   :  { %v294_v4 = vadd.f32 %v293_v2, %v290_v3 }
 0x14d   :  { %v295_v5 = vrot.slane %v294_v4, 4 }
 0x14f   :  { %v296_v6 = vadd.f32 %v295_v5, %v294_v4 }
 0x151   :  { %v297_v7 = vrot.slane %v296_v6, 2 }
 0x153   :  { %v298_v8 = vadd.f32 %v297_v7, %v296_v6 }
 0x155   :  { %v299_v9 = vrot.slane %v298_v8, 1 }
 0x157   :  { %v300_v11 = vadd.f32 %v299_v9, %v298_v8 }
 0x159   :  { %v302_v12 = vadd.f32 %v301_v10, %v300_v11 }
 0x15b   :  { %v303_v13 = vmul.f32 0.5, %v302_v12 }
 0x15d   :  { %378 = vtanh.f32 %v303_v13 }
 0x163   :  { %v379_v14 = vpop.eup %378 }
 0x164   :  { %v305_v15 = vmul.f32 0.5, %v379_v14 }
 0x166   :  { %v306_v16 = vadd.f32 0.5, %v305_v15 }
 0x168   :  { %307 = vst [vmem:[#allocation3] sm:$0x1] %v306_v16 }
 0x169   :  { %318 = dma.vmem_to_hbm [thread:$0]  %s314_s27, 16, %s316_s30, [#allocation4]  }
 0x16a   :  { %404 = dma.done.wait [#allocation4], 16  }
 0x16b   :  { %405 = vsyncadd [#allocation4], 4294967280 }
 0x16c   :  { %323 = vsyncpa [#allocation4], 1 }

</bundles_post_ra>
